<compile_context>
chip_gen: v6e
topology: v6e:2x2x1
jax: 0.10.0
libtpu: 0.0.40
codegen_flags: <defaults>
</compile_context>

<pallas_src>
import numpy as np
import jax
import jax.numpy as jnp
from jax import lax
from jax.experimental import pallas as pl
from jax.experimental.pallas import tpu as pltpu


# ---------------------------------------------------------------------------
# Parameter helpers (host-side, one-time)
# ---------------------------------------------------------------------------
def _transpose_conv_to_conv_weight(wt):
    """PyTorch ConvTranspose2d weight (Cin, Cout, kh, kw), stride=1, pad=1
    ==> equivalent cross-correlation weight in HWIO layout (3, 3, Cin, Cout)."""
    return jnp.transpose(wt[:, :, ::-1, ::-1], (2, 3, 0, 1))


def _fold_bn(gamma, beta, mean, var, eps=1e-5):
    scale = gamma / jnp.sqrt(var + eps)
    bias = beta - mean * scale
    return scale, bias


def _banded_tap_weights(w_hwio, scale, W):
    """Fold BN scale into the conv weight and build, for each vertical tap kh,
    a (W*Cin, W*Cout) block-banded matrix applying the horizontal 3-tap conv
    (implicit zero padding) to an image row flattened as (W*Cin,):

        band[kh, jj*Cin + c, j*Cout + p] = w[kh, jj-j+1, c, p] * scale[p]   if |jj-j| <= 1
    """
    w = np.asarray(w_hwio, np.float32) * np.asarray(scale, np.float32)[None, None, None, :]
    _, _, cin, cout = w.shape
    band = np.zeros((3, W * cin, W * cout), np.float32)
    for kh in range(3):
        for kw in range(3):
            for j in range(W):
                jj = j + kw - 1
                if 0 <= jj < W:
                    band[kh, jj * cin:(jj + 1) * cin, j * cout:(j + 1) * cout] = w[kh, kw]
    return band


def make_params(key, inplanes, planes):
    """Raw module parameters (ConvTranspose2d weights + inference-mode BN stats)."""
    k3, k1 = jax.random.split(key, 2)
    wt3 = 0.1 * jax.random.normal(k3, (inplanes, planes, 3, 3), jnp.float32)
    wt1 = 0.1 * jax.random.normal(k1, (planes, planes, 3, 3), jnp.float32)
    idx = jnp.arange(planes, dtype=jnp.float32)
    bn3 = (1.0 + 0.10 * idx, 0.05 * idx, 0.02 * idx, 1.0 + 0.03 * idx)  # gamma, beta, mean, var
    bn1 = (1.0 - 0.05 * idx, -0.03 * idx, 0.01 * idx, 1.0 + 0.02 * idx)
    return {"wt3": wt3, "wt1": wt1, "bn3": bn3, "bn1": bn1}


def prepare_kernel_params(raw, W):
    """Kernel weights: BN folded, banded over the row layout, taps concatenated along
    the output dim (so each stage is a single MXU matmul), cast to bf16."""
    w3 = _transpose_conv_to_conv_weight(raw["wt3"])   # (3,3,Cin,P)
    w1 = _transpose_conv_to_conv_weight(raw["wt1"])   # (3,3,P,P)
    s3, b3 = _fold_bn(*raw["bn3"])
    s1, b1 = _fold_bn(*raw["bn1"])
    P = w3.shape[-1]
    band3 = _banded_tap_weights(w3, s3, W)            # (3, W*Cin, W*P)
    band1 = _banded_tap_weights(w1, s1, W)            # (3, W*P,  W*P)
    w_s1 = np.concatenate([band3[0], band3[1], band3[2]], axis=-1)   # (W*Cin, 3*W*P)
    w_s2 = np.concatenate([band1[0], band1[1], band1[2]], axis=-1)   # (W*P,   3*W*P)
    return {
        "w_s1": jnp.asarray(w_s1, jnp.bfloat16),
        "b_s1": jnp.tile(b3, W).reshape(1, W * P).astype(jnp.float32),
        "w_s2": jnp.asarray(w_s2, jnp.bfloat16),
        "b_s2": jnp.tile(b1, W).reshape(1, W * P).astype(jnp.float32),
    }


# ---------------------------------------------------------------------------
# Fused Bottleneck18 forward
# ---------------------------------------------------------------------------
def _pick_images_per_block(n_images, h, w, target_pixels=512):
    """Images per grid step: ~512 output pixels per step (amortize ~0.35us per-step
    overhead) while keeping >= 2 grid steps when the batch allows (megacore)."""
    tb = max(1, min(n_images, target_pixels // max(1, h * w)))
    while tb > 1 and n_images // tb < 2:
        tb -= 1
    while n_images % tb:            # grid must tile the batch exactly
        tb -= 1
    return tb


def bottleneck18_forward(x_nchw, kp):
    N, Cin, H, W = x_nchw.shape
    Win = kp["w_s1"].shape[0]        # = W * Cin
    F = kp["w_s2"].shape[0]          # = W * planes  (lane-dense output width)
    P = F // W
    Hp = H + 2
    assert Win == W * Cin and kp["w_s1"].shape[1] == 3 * F

    # Cheap host-side glue (~1.1x copy, bf16): NCHW -> vertically padded row layout
    # (N, H+2, W*Cin).  Horizontal padding is baked into the banded weights.
    x_rows = jnp.transpose(x_nchw, (0, 2, 3, 1)).reshape(N, H, Win)
    x_pad = jnp.pad(x_rows, ((0, 0), (1, 1), (0, 0))).astype(jnp.bfloat16)

    TB = _pick_images_per_block(N, H, W)
    grid = (N // TB,)

    def kernel(x_ref, w1_ref, b1_ref, w2_ref, b2_ref, o_ref, h_ref):
        # h_ref: (Hp, F) bf16 scratch = vertically padded intermediate (VMEM-resident).
        @pl.when(pl.program_id(0) == 0)
        def _init():                                   # halo rows 0 / Hp-1 stay zero forever
            h_ref[...] = jnp.zeros_like(h_ref)

        for b in range(TB):                            # static unroll; images independent
            # ---- stage 1: conv3 (single banded matmul, 3 taps stacked on N') + bn3 + relu
            xb = x_ref[b]                              # (Hp, Win) bf16
            z = jnp.dot(xb, w1_ref[...], preferred_element_type=jnp.float32)   # (Hp, 3F)
            a1 = z[0:H, 0:F] + z[1:H + 1, F:2 * F] + z[2:H + 2, 2 * F:3 * F]   # (H, F)
            h_ref[pl.ds(1, H), :] = jnp.maximum(a1 + b1_ref[...], 0.0).astype(h_ref.dtype)
            # ---- stage 2: conv1 + bn1 + relu, reading the padded intermediate from VMEM
            hp = h_ref[...]                            # (Hp, F) bf16
            y = jnp.dot(hp, w2_ref[...], preferred_element_type=jnp.float32)   # (Hp, 3F)
            a2 = y[0:H, 0:F] + y[1:H + 1, F:2 * F] + y[2:H + 2, 2 * F:3 * F]
            o_ref[b] = jnp.maximum(a2 + b2_ref[...], 0.0).astype(o_ref.dtype)

    flops = 2 * N * Hp * 3 * F * (Win + F)             # 2*M*K*N' per stage, N'=3F
    bytes_accessed = (N * Hp * Win * 2                 # bf16 activations in
                      + Win * 3 * F * 2 + F * 3 * F * 2 + 2 * F * 4   # weights / biases
                      + N * H * F * 4)                 # f32 lane-dense out

    out = pl.pallas_call(
        kernel,
        out_shape=jax.ShapeDtypeStruct((N, H, F), jnp.float32),
        grid_spec=pltpu.PrefetchScalarGridSpec(
            num_scalar_prefetch=0,
            grid=grid,
            in_specs=[
                pl.BlockSpec((TB, Hp, Win), lambda g: (g, 0, 0)),
                pl.BlockSpec((Win, 3 * F), lambda g: (0, 0)),
                pl.BlockSpec((1, F), lambda g: (0, 0)),
                pl.BlockSpec((F, 3 * F), lambda g: (0, 0)),
                pl.BlockSpec((1, F), lambda g: (0, 0)),
            ],
            out_specs=pl.BlockSpec((TB, H, F), lambda g: (g, 0, 0)),
            scratch_shapes=[pltpu.VMEM((Hp, F), jnp.bfloat16)],
        ),
        compiler_params=pltpu.CompilerParams(
            dimension_semantics=("parallel",),
            vmem_limit_bytes=32 * 1024 * 1024,         # explicit; safe on v5e/v6e/v7x
        ),
        cost_estimate=pl.CostEstimate(
            flops=flops, transcendentals=0, bytes_accessed=bytes_accessed),
    )(x_pad, kp["w_s1"], kp["b_s1"], kp["w_s2"], kp["b_s2"])

    # lane-dense (N, H, W*P) -> NCHW
    return jnp.transpose(out.reshape(N, H, W, P), (0, 3, 1, 2))


# ---------------------------------------------------------------------------
# Pure-JAX reference for validation
# ---------------------------------------------------------------------------
def ref_forward(x_nchw, raw, *, mirror_bf16=False):
    """Module forward (stride=1, upsample=None) in f32.  With mirror_bf16=True the
    inputs / folded weights / intermediate are rounded through bf16 exactly like
    the kernel's matmul operands (for a tight numerical check)."""
    def stage(x, wt, bn):
        w = _transpose_conv_to_conv_weight(wt)
        s, b = _fold_bn(*bn)
        wf = w * s
        if mirror_bf16:
            x = x.astype(jnp.bfloat16).astype(jnp.float32)
            wf = wf.astype(jnp.bfloat16).astype(jnp.float32)
        y = lax.conv_general_dilated(
            x, wf, window_strides=(1, 1), padding=((1, 1), (1, 1)),
            dimension_numbers=("NHWC", "HWIO", "NHWC"),
            precision=lax.Precision.HIGHEST)
        return jnp.maximum(y + b, 0.0)

    x = jnp.transpose(x_nchw, (0, 2, 3, 1))
    h = stage(x, raw["wt3"], raw["bn3"])
    o = stage(h, raw["wt1"], raw["bn1"])
    return jnp.transpose(o, (0, 3, 1, 2))


# ---------------------------------------------------------------------------
if __name__ == "__main__":
    key = jax.random.PRNGKey(0)
    kx, kparam = jax.random.split(key)

    N, inplanes, planes, H, W = 2, 4, 8, 16, 16   # expansion=2 style decoder block
    x = jax.random.normal(kx, (N, inplanes, H, W), jnp.float32)   # NCHW, like PyTorch
    raw = make_params(kparam, inplanes, planes)
    kp = prepare_kernel_params(raw, W)

    out = jax.block_until_ready(bottleneck18_forward(x, kp))
    assert out.shape == (N, planes, H, W), out.shape

    # tight check: exact module math at the kernel's bf16 operand precision
    ref_q = jax.block_until_ready(ref_forward(x, raw, mirror_bf16=True))
    assert jnp.allclose(out, ref_q, atol=1e-2, rtol=1e-2), float(jnp.abs(out - ref_q).max())

    # sanity check: full-f32 module semantics (tolerance reflects bf16 matmul operands)
    ref_f = jax.block_until_ready(ref_forward(x, raw, mirror_bf16=False))
    assert jnp.allclose(out, ref_f, atol=1e-1, rtol=5e-2), float(jnp.abs(out - ref_f).max())

    print("KERNEL_OK")
</pallas_src>

<mosaic_0001>
module attributes {stable_mosaic.version = 11 : i64} {
  func.func @kernel(%arg0: i32, %arg1: memref<1x18x64xbf16, #tpu.memory_space<vmem>>, %arg2: memref<64x384xbf16, #tpu.memory_space<vmem>>, %arg3: memref<1x128xf32, #tpu.memory_space<vmem>>, %arg4: memref<128x384xbf16, #tpu.memory_space<vmem>>, %arg5: memref<1x128xf32, #tpu.memory_space<vmem>>, %arg6: memref<1x16x128xf32, #tpu.memory_space<vmem>>, %arg7: memref<18x128xbf16, #tpu.memory_space<vmem>>) attributes {dimension_semantics = [#tpu.dimension_semantics<parallel>], iteration_bounds = array<i64: 2>, scalar_prefetch = 0 : i64, scratch_operands = 1 : i64, tpu.core_type = #tpu.core_type<tc>, window_params = [{transform_indices = @transform_0, window_bounds = array<i64: 1, 18, 64>}, {pipeline_mode = #tpu.pipeline_mode<synchronous>, transform_indices = @transform_1, window_bounds = array<i64: 64, 384>}, {pipeline_mode = #tpu.pipeline_mode<synchronous>, transform_indices = @transform_2, window_bounds = array<i64: 1, 128>}, {pipeline_mode = #tpu.pipeline_mode<synchronous>, transform_indices = @transform_3, window_bounds = array<i64: 128, 384>}, {pipeline_mode = #tpu.pipeline_mode<synchronous>, transform_indices = @transform_4, window_bounds = array<i64: 1, 128>}, {transform_indices = @transform_5, window_bounds = array<i64: 1, 16, 128>}]} {
    %c0_i32 = arith.constant 0 : i32
    %0 = arith.cmpi eq, %arg0, %c0_i32 : i32
    %1 = arith.extui %0 : i1 to i32
    %c0_i32_0 = arith.constant 0 : i32
    %2 = arith.cmpi ne, %1, %c0_i32_0 : i32
    scf.if %2 {
      %cst_20 = arith.constant 0.000000e+00 : bf16
      %35 = vector.broadcast %cst_20 : bf16 to vector<18x128xbf16>
      %c0_21 = arith.constant 0 : index
      %c0_22 = arith.constant 0 : index
      %36 = vector.load %arg7[%c0_21, %c0_22] : memref<18x128xbf16, #tpu.memory_space<vmem>>, vector<18x128xbf16>
      tpu.vector_store %arg7[%c0_21, %c0_22], %35 {strides = array<i32>} : memref<18x128xbf16, #tpu.memory_space<vmem>>, vector<18x128xbf16>,
    } else {
    }
    %c0 = arith.constant 0 : index
    %c0_1 = arith.constant 0 : index
    %c0_2 = arith.constant 0 : index
    %3 = vector.load %arg1[%c0, %c0_1, %c0_2] : memref<1x18x64xbf16, #tpu.memory_space<vmem>>, vector<1x18x64xbf16>
    %4 = vector.shape_cast %3 : vector<1x18x64xbf16> to vector<18x64xbf16>
    %c0_3 = arith.constant 0 : index
    %c0_4 = arith.constant 0 : index
    %5 = vector.load %arg2[%c0_3, %c0_4] : memref<64x384xbf16, #tpu.memory_space<vmem>>, vector<64x384xbf16>
    %cst = arith.constant dense<0.000000e+00> : vector<18x384xf32>
    %6 = tpu.matmul %4, %5, %cst {dimension_numbers = #tpu.dot_dimension_numbers<[1], [0], [0], [1], [0, 0, 1, 1], [], []>} : vector<18x64xbf16>, vector<64x384xbf16>, vector<18x384xf32> -> vector<18x384xf32>
    %7 = vector.extract_strided_slice %6 {offsets = [0, 0], sizes = [16, 128], strides = [1, 1]} : vector<18x384xf32> to vector<16x128xf32>
    %8 = vector.extract_strided_slice %6 {offsets = [1, 128], sizes = [16, 128], strides = [1, 1]} : vector<18x384xf32> to vector<16x128xf32>
    %9 = arith.addf %7, %8 : vector<16x128xf32>
    %10 = vector.extract_strided_slice %6 {offsets = [2, 256], sizes = [16, 128], strides = [1, 1]} : vector<18x384xf32> to vector<16x128xf32>
    %11 = arith.addf %9, %10 : vector<16x128xf32>
    %c0_5 = arith.constant 0 : index
    %c0_6 = arith.constant 0 : index
    %12 = vector.load %arg3[%c0_5, %c0_6] : memref<1x128xf32, #tpu.memory_space<vmem>>, vector<1x128xf32>
    %13 = vector.broadcast %12 : vector<1x128xf32> to vector<16x128xf32>
    %14 = arith.addf %11, %13 : vector<16x128xf32>
    %cst_7 = arith.constant 0.000000e+00 : f32
    %15 = vector.broadcast %cst_7 : f32 to vector<16x128xf32>
    %16 = arith.maximumf %14, %15 : vector<16x128xf32>
    %17 = arith.truncf %16 : vector<16x128xf32> to vector<16x128xbf16>
    %c1 = arith.constant 1 : index
    %c0_8 = arith.constant 0 : index
    %18 = vector.load %arg7[%c1, %c0_8] : memref<18x128xbf16, #tpu.memory_space<vmem>>, vector<16x128xbf16>
    tpu.vector_store %arg7[%c1, %c0_8], %17 {strides = array<i32>} : memref<18x128xbf16, #tpu.memory_space<vmem>>, vector<16x128xbf16>,
    %c0_9 = arith.constant 0 : index
    %c0_10 = arith.constant 0 : index
    %19 = vector.load %arg7[%c0_9, %c0_10] : memref<18x128xbf16, #tpu.memory_space<vmem>>, vector<18x128xbf16>
    %c0_11 = arith.constant 0 : index
    %c0_12 = arith.constant 0 : index
    %20 = vector.load %arg4[%c0_11, %c0_12] : memref<128x384xbf16, #tpu.memory_space<vmem>>, vector<128x384xbf16>
    %cst_13 = arith.constant dense<0.000000e+00> : vector<18x384xf32>
    %21 = tpu.matmul %19, %20, %cst_13 {dimension_numbers = #tpu.dot_dimension_numbers<[1], [0], [0], [1], [0, 0, 1, 1], [], []>} : vector<18x128xbf16>, vector<128x384xbf16>, vector<18x384xf32> -> vector<18x384xf32>
    %22 = vector.extract_strided_slice %21 {offsets = [0, 0], sizes = [16, 128], strides = [1, 1]} : vector<18x384xf32> to vector<16x128xf32>
    %23 = vector.extract_strided_slice %21 {offsets = [1, 128], sizes = [16, 128], strides = [1, 1]} : vector<18x384xf32> to vector<16x128xf32>
    %24 = arith.addf %22, %23 : vector<16x128xf32>
    %25 = vector.extract_strided_slice %21 {offsets = [2, 256], sizes = [16, 128], strides = [1, 1]} : vector<18x384xf32> to vector<16x128xf32>
    %26 = arith.addf %24, %25 : vector<16x128xf32>
    %c0_14 = arith.constant 0 : index
    %c0_15 = arith.constant 0 : index
    %27 = vector.load %arg5[%c0_14, %c0_15] : memref<1x128xf32, #tpu.memory_space<vmem>>, vector<1x128xf32>
    %28 = vector.broadcast %27 : vector<1x128xf32> to vector<16x128xf32>
    %29 = arith.addf %26, %28 : vector<16x128xf32>
    %cst_16 = arith.constant 0.000000e+00 : f32
    %30 = vector.broadcast %cst_16 : f32 to vector<16x128xf32>
    %31 = arith.maximumf %29, %30 : vector<16x128xf32>
    %c0_17 = arith.constant 0 : index
    %c0_18 = arith.constant 0 : index
    %c0_19 = arith.constant 0 : index
    %32 = vector.load %arg6[%c0_17, %c0_18, %c0_19] : memref<1x16x128xf32, #tpu.memory_space<vmem>>, vector<1x16x128xf32>
    %33 = vector.shape_cast %32 : vector<1x16x128xf32> to vector<16x128xf32>
    %34 = vector.shape_cast %31 : vector<16x128xf32> to vector<1x16x128xf32>
    tpu.vector_store %arg6[%c0_17, %c0_18, %c0_19], %34 {strides = array<i32>} : memref<1x16x128xf32, #tpu.memory_space<vmem>>, vector<1x16x128xf32>,
    return
  }
  func.func @transform_0(%arg0: i32) -> (i32, i32, i32) {
    %c0_i32 = arith.constant 0 : i32
    %c0_i32_0 = arith.constant 0 : i32
    %c0_i32_1 = arith.constant 0 : i32
    return %arg0, %c0_i32, %c0_i32_0 : i32, i32, i32
  }
  func.func @transform_1(%arg0: i32) -> (i32, i32) {
    %c0_i32 = arith.constant 0 : i32
    %c0_i32_0 = arith.constant 0 : i32
    %c0_i32_1 = arith.constant 0 : i32
    return %c0_i32, %c0_i32_0 : i32, i32
  }
  func.func @transform_2(%arg0: i32) -> (i32, i32) {
    %c0_i32 = arith.constant 0 : i32
    %c0_i32_0 = arith.constant 0 : i32
    %c0_i32_1 = arith.constant 0 : i32
    return %c0_i32, %c0_i32_0 : i32, i32
  }
  func.func @transform_3(%arg0: i32) -> (i32, i32) {
    %c0_i32 = arith.constant 0 : i32
    %c0_i32_0 = arith.constant 0 : i32
    %c0_i32_1 = arith.constant 0 : i32
    return %c0_i32, %c0_i32_0 : i32, i32
  }
  func.func @transform_4(%arg0: i32) -> (i32, i32) {
    %c0_i32 = arith.constant 0 : i32
    %c0_i32_0 = arith.constant 0 : i32
    %c0_i32_1 = arith.constant 0 : i32
    return %c0_i32, %c0_i32_0 : i32, i32
  }
  func.func @transform_5(%arg0: i32) -> (i32, i32, i32) {
    %c0_i32 = arith.constant 0 : i32
    %c0_i32_0 = arith.constant 0 : i32
    %c0_i32_1 = arith.constant 0 : i32
    return %arg0, %c0_i32, %c0_i32_0 : i32, i32, i32
  }
}

</mosaic_0001>

<bundles_post_ra>
// kernel: tpu_custom_call.1
= control target key start
LH: loop header
LB: loop body
LE: loop exit
PB: predicated region body
PF: predicated region fallthrough
CT: control target
= control target key end

     0   :  { %10 = vsyncpa [#allocation4], 0  ;;  %s1513_s0 = inlined_call_operand.vmem [shape: bf16[2,18,64], index: 0, kind: input, shape index: {}]   ;;  %s1514_s1 = inlined_call_operand.hbm [shape: bf16[64,384], index: 1, kind: input, shape index: {}]   ;;  %s1515_s2 = inlined_call_operand.vmem [shape: f32[1,128], index: 2, kind: input, shape index: {}]   ;;  %s1516_s3 = inlined_call_operand.hbm [shape: bf16[128,384], index: 3, kind: input, shape index: {}]   ;;  %s1517_s4 = inlined_call_operand.vmem [shape: f32[1,128], index: 4, kind: input, shape index: {}]   ;;  %s1518_s5 = inlined_call_operand.hbm [shape: f32[2,16,128], index: 5, kind: output, shape index: {}]  }
   0x1   :  { %11 = vsyncpa [#allocation7], 0 }
   0x2   :  { %12 = vsyncpa [#allocation5], 0 }
   0x3   :  { %14 = vsyncpa [#allocation5 + $0x1], 0  ;;  %s1336_s18 = smov 0   ;;  %s1338_s19 = smov 0  }
   0x4   :  { %s1340_s20 = smov 0   ;;  %s1342_s21 = smov 0  }
   0x5 LB: > { %s1357_s22 = sadd.s32 4294967295, %s1295_s21   ;;  %s941_s23 = sadd.s32 4294967294, %s1295_s21   ;;  %s1295_s21 = sphi %s1342_s21, %s1533_s21   ;;  %s1291_s20 = sphi %s1340_s20, %s1532_s20   ;;  %s1287_s19 = sphi %s1338_s19, %s1531_s19   ;;  %s1283_s18 = sphi %s1336_s18, %s1530_s18  }
   0x6   : > { %s1361_s24 = sadd.s32 1, %s1295_s21   ;;  %s137_s25 = sadd.s32 1, %s1291_s20 }
   0x7   : > { %s134_s26 = ssub.s32 %s1295_s21, %s1361_s24  ;;  %p147_p0 = scmp.ne.s32.totalorder %s1291_s20, %s1287_s19 }
   0x8   : > { %p135_p1 = scmp.eq.s32.totalorder %s134_s26, 0  ;;  %p148_p2 = scmp.eq.s32.totalorder %s1357_s22, 1 }
   0x9   : > { %p153_p3 = scmp.ne.s32.totalorder %s1287_s19, %s1283_s18  ;;  %p154_p4 = scmp.eq.s32.totalorder %s941_s23, 1 }
   0xa   : > { %s1372_s27 = scalar_select %p135_p1, %s1291_s20, %s137_s25  }
   0xb   : > { %p1374_p5 = por %p148_p2, %p147_p0  ;;  %p1378_p6 = por %p154_p4, %p153_p3 }
   0xc   : > { %p942_p7 = scmp.ge.s32.totalorder %s1295_s21, 1  ;;  %p161_p8 = scmp.lt.s32.totalorder %s1295_s21, 3 }
   0xd   : > { %s1521_s29 = scalar_select %p1378_p6, 1, 0 }
   0xe   : > { %p1519_p10 = scmp.eq.s32.totalorder %s1357_s22, 0  ;;  %p1386_p11 = pnand %p942_p7, %p161_p8 }
   0xf   : > { %s1297_s6 = smov [#allocation3]   ;;  %s1298_s9 = smov [#allocation6]  }
  0x10   : > { %s173_s7 = sshll.u32 %s1297_s6, 4  ;;  %p1067_p12 = pneg %p1386_p11  ;;  %s174_s7 = int_to_ptr.vmem [resolvable:$true] %s173_s7 }
  0x11   : > { %s189_s10 = sshll.u32 %s1298_s9, 4  ;;  %s1186_s11 = scalar_lea.vmem %s174_s7, 1536  ;;  %s190_s10 = int_to_ptr.vmem [resolvable:$true] %s189_s10 }
  0x12   : > { %p1394_p13 = pnand %p1519_p10, %p1067_p12  ;;  %p1187_p1 = scmp.ne.s32.totalorder %s174_s7, %s1186_s11 }
  0x13   : > { %p1194_p4 = scmp.lt.s32.totalorder %s174_s7, %s174_s7  ;;  %p1195_p7 = scmp.lt.s32.totalorder %s1186_s11, %s1186_s11 }
  0x14   : > { %p1177_p0 = pneg %p1394_p13 }
  0x15   : > { %p1196_p8 = por %p1195_p7, %p1194_p4 }
  0x16   : > { %p1189_p2 = pnand %p1187_p1, %p1177_p0 }
  0x18   : > { %p1190_p3 = pneg %p1189_p2 }
  0x1a   : > { %p1197_p12 = pnand %p1196_p8, %p1190_p3 }
  0x1c   : > { %1200 = shalt.err (!%p1197_p12)
}
  0x1d   : > { %s1299_s12 = smov 192   ;;  %s1300_s13 = smov 12  }
  0x1e   : > { %1070 = dma.hbm_to_vmem [thread:$0]  (!%p1394_p13), %s1514_s1, 1536, %s174_s7, [#allocation4], %s1299_s12, %s1299_s12, %s1300_s13  }
  0x1f   : > { %s1212_s16 = scalar_lea.vmem %s190_s10, 3072  ;;  %p1220_p10 = scmp.lt.s32.totalorder %s190_s10, %s190_s10 }
  0x20   : > { %p1213_p9 = scmp.ne.s32.totalorder %s190_s10, %s1212_s16  ;;  %p1221_p6 = scmp.lt.s32.totalorder %s1212_s16, %s1212_s16 }
  0x22   : > { %p1215_p1 = pnand %p1213_p9, %p1177_p0  ;;  %p1222_p4 = por %p1221_p6, %p1220_p10 }
  0x24   : > { %p1216_p2 = pneg %p1215_p1 }
  0x26   : > { %p1223_p3 = pnand %p1222_p4, %p1216_p2 }
  0x28   : > { %1226 = shalt.err (!%p1223_p3)
}
  0x29   : > { %1073 = dma.hbm_to_vmem [thread:$0]  (!%p1394_p13), %s1516_s3, 3072, %s190_s10, [#allocation7], %s1299_s12, %s1299_s12, %s1300_s13  }
  0x2a   : > { %216 = sbr.rel (%p1386_p11) target bundleno = 538 (0x21a), region = 40  ;;  %p1524_p7 = scmp.eq.s32.totalorder (!%p1386_p11), %s1357_s22, 0 }
  0x2f   : > { %1270 = dma.done.wait (%p1524_p7), [#allocation4], 1536   ;;  %p1525_p9 = pmov %p1524_p7 }
  0x30   : > { %p1526_p0 = pmov %p1524_p7 }
  0x31   : > { %1272 = vsyncadd (%p1525_p9), [#allocation4], 4294965760 }
  0x32   : > { %1274 = dma.done.wait (%p1526_p0), [#allocation7], 3072   ;;  %p1527_p6 = pmov %p1526_p0 }
  0x33   : > { %s245_s25 = sand.u32 1, %s1287_s19   ;;  %p248_p10 = scmp.lt.s32.totalorder %s1357_s22, 1 }
  0x34   : > { %1276 = vsyncadd (%p1527_p6), [#allocation7], 4294964224  ;;  %s949_s26 = sshll.u32 %s245_s25, 4  ;;  %p1528_p11 = scmp.ne.s32.totalorder %s1357_s22, 0 }
  0x35   : > { %s249_s30 = scalar_select %p248_p10, %s1357_s22, 1 }
  0x36   : > { %s1436_s10 = scalar_lea.vmem [#allocation8], %s949_s26  ;;  %257 = sbr.rel (%p1528_p11) target bundleno = 62 (0x3e), region = 52 }
  0x37   : > { %s1056_s6 = smul.u32 12, %s249_s30 }
  0x39   : > { %s1434_s9 = scalar_lea.vmem %s1513_s0, %s1056_s6 }
  0x3b   : > { %v1301_v0 = vmov 0  }
  0x3c   : > { %258 = vst [vmem:[#allocation2] sm:$0xf] %v1301_v0  ;;  %259 = vst [vmem:[#allocation2 + $0x4] sm:$0xf] %v1301_v0 }
  0x3d   : > { %260 = vst [vmem:[#allocation2 + $0x8] sm:$0x1] %v1301_v0 }
  0x3e PF: > { %v1123_v1 = vld [vmem:[#allocation3 + $0x4c] ss:$12 sps:$4 sm:$0xff]   ;;  %v1125_v2 = vld [vmem:[#allocation3 + $0x50] ss:$12 sps:$4 sm:$0xff]   ;;  %v1302_v3 = vmov 0   ;;  %vm352_vm0 = vcmask 523264  }
  0x3f   : > { %391 = vmatprep.mubr.bf16.mxu0 %v1302_v3  ;;  %367 = vmatprep.subr.bf16.mxu0 %v1123_v1  ;;  %v1126_v4 = vld [vmem:[#allocation3 + $0x48] ss:$12 sps:$4 sm:$0xff]   ;;  %v1129_v6 = vld [vmem:[#allocation3 + $0x38] ss:$12 sps:$4 sm:$0xff]   ;;  %v1130_v7 = vld [vmem:[#allocation3 + $0x30] ss:$12 sps:$4 sm:$0xff]  }
  0x40   : > { %1024 = vmatprep.subr.bf16.mxu1 %v1125_v2  ;;  %v1127_v5 = vld [vmem:[#allocation3 + $0x34] ss:$12 sps:$4 sm:$0xff]   ;;  %368 = vmatpush1.bf16.msra.mxu0 %v1126_v4  ;;  %v1131_v8 = vld [vmem:[#allocation3 + $0x1c] ss:$12 sps:$4 sm:$0xff]   ;;  %v1134_v10 = vld [vmem:[#allocation3 + $0x18] ss:$12 sps:$4 sm:$0xff]  }
  0x41   : > { %1025 = vmatpush3.bf16.msra.mxu1 %v1125_v2  ;;  %369 = vmatprep.subr.bf16.mxu0 %v1127_v5  ;;  %v1133_v9 = vld [vmem:[#allocation3 + $0x20] ss:$12 sps:$4 sm:$0xff]   ;;  %v1135_v11 = vld [vmem:[#allocation3 + $0x4] ss:$12 sps:$4 sm:$0xff]   ;;  %v1137_v12 = vld [vmem:[#allocation3 + $0x8] ss:$12 sps:$4 sm:$0xff]  }
  0x42   : > { %1026 = vmatprep.subr.bf16.mxu1 %v1129_v6  ;;  %v1138_v13 = vld [vmem:[#allocation3] ss:$12 sps:$4 sm:$0xff]   ;;  %v1139_v14 = vld [vmem:[%s1434_s9] sm:$0xff]   ;;  %v1140_v15 = vld [vmem:[%s1434_s9 + $0x8] ss:$0 sps:$4 sm:$0x11]  }
  0x43   : > { %1032 = vmatprep.mubr.msk.bf16.mxu1 %vm352_vm0, %v1139_v14  ;;  %v1143_v16 = vld [vmem:[#allocation6 + $0xac] ss:$12 sps:$4 sm:$0xff]   ;;  %v1141_v17 = vld [vmem:[#allocation6 + $0xa8] ss:$12 sps:$4 sm:$0xff]   ;;  %v1144_v18 = vld [vmem:[#allocation6 + $0xb0] ss:$12 sps:$4 sm:$0xff]  }
  0x44   : > { %370 = vmatpush1.bf16.msra.mxu0 %v1130_v7  ;;  %v1147_v19 = vld [vmem:[#allocation6 + $0x94] ss:$12 sps:$4 sm:$0xff]   ;;  %v1145_v20 = vld [vmem:[#allocation6 + $0x90] ss:$12 sps:$4 sm:$0xff]   ;;  %v1148_v21 = vld [vmem:[#allocation6 + $0x98] ss:$12 sps:$4 sm:$0xff]  }
  0x45   : > { %1027 = vmatpush3.bf16.msra.mxu1 %v1129_v6  ;;  %371 = vmatprep.subr.bf16.mxu0 %v1131_v8  ;;  %v1151_v22 = vld [vmem:[#allocation6 + $0x7c] ss:$12 sps:$4 sm:$0xff]   ;;  %v1149_v23 = vld [vmem:[#allocation6 + $0x78] ss:$12 sps:$4 sm:$0xff]   ;;  %v1152_v24 = vld [vmem:[#allocation6 + $0x80] ss:$12 sps:$4 sm:$0xff]  }
  0x46   : > { %1028 = vmatprep.subr.bf16.mxu1 %v1133_v9  ;;  %v1155_v25 = vld [vmem:[#allocation6 + $0x64] ss:$12 sps:$4 sm:$0xff]   ;;  %v1153_v26 = vld [vmem:[#allocation6 + $0x60] ss:$12 sps:$4 sm:$0xff]   ;;  %v1156_v27 = vld [vmem:[#allocation6 + $0x68] ss:$12 sps:$4 sm:$0xff]  }
  0x47   : > { %v1159_v28 = vld [vmem:[#allocation6 + $0x4c] ss:$12 sps:$4 sm:$0xff]   ;;  %v1157_v29 = vld [vmem:[#allocation6 + $0x48] ss:$12 sps:$4 sm:$0xff]   ;;  %v1160_v30 = vld [vmem:[#allocation6 + $0x50] ss:$12 sps:$4 sm:$0xff]  }
  0x48   : > { %372 = vmatpush1.bf16.msra.mxu0 %v1134_v10  ;;  %v1163_v31 = vld [vmem:[#allocation6 + $0x34] ss:$12 sps:$4 sm:$0xff]   ;;  %v1161_v32 = vld [vmem:[#allocation6 + $0x30] ss:$12 sps:$4 sm:$0xff]   ;;  %v1164_v33 = vld [vmem:[#allocation6 + $0x38] ss:$12 sps:$4 sm:$0xff]  }
  0x49   : > { %1029 = vmatpush3.bf16.msra.mxu1 %v1133_v9  ;;  %373 = vmatprep.subr.bf16.mxu0 %v1135_v11  ;;  %v1167_v34 = vld [vmem:[#allocation6 + $0x1c] ss:$12 sps:$4 sm:$0xff]   ;;  %v1165_v35 = vld [vmem:[#allocation6 + $0x18] ss:$12 sps:$4 sm:$0xff]   ;;  %v1168_v36 = vld [vmem:[#allocation6 + $0x20] ss:$12 sps:$4 sm:$0xff]  }
  0x4a   : > { %1030 = vmatprep.subr.bf16.mxu1 %v1137_v12  ;;  %v1171_v37 = vld [vmem:[#allocation6 + $0x4] ss:$12 sps:$4 sm:$0xff]   ;;  %v1172_v38 = vld [vmem:[#allocation6 + $0x8] ss:$12 sps:$4 sm:$0xff]   ;;  %v1169_v39 = vld [vmem:[#allocation6] ss:$12 sps:$4 sm:$0xff]  }
  0x4b   : > { %vm460_vm1 = vcmask 1046528   ;;  %vm473_vm2 = vcmask 1045504   ;;  %v970_v58 = vld [vmem:[%s1515_s2] ss:$0 sm:$0xff]  ;;  %vm523_vm3 = vcmask 1043456   ;;  %vm530_vm8 = vcmask 1040384  }
  0x4c   : > { %374 = vmatpush1.bf16.msra.mxu0 %v1138_v13  ;;  %vm524_vm4 = vsmask.f32 7938  ;;  %v526_v13 = vld [vmem:[#allocation2] sm:$0xf]  ;;  %vm500_vm6 = vsmask.f32 256 }
  0x4d   : > { %1031 = vmatpush3.bf16.msra.mxu1 %v1137_v12  ;;  %708 = vmatprep.subr.bf16.mxu0 %v1143_v16  ;;  %vm525_vm5 = vmand %vm523_vm3, %vm524_vm4  ;;  %vm501_vm7 = vsmask.f32 4368  ;;  %s1007_s15 = sshll.u32 %s1357_s22, 8  ;;  %s857_s16 = sshll.u32 %s1436_s10, 4  ;;  %s1468_s16 = int_to_ptr.vmem [resolvable:$true] %s857_s16 }
  0x4e   : > { %1036 = vmatprep.subr.bf16.mxu1 %v1144_v18  ;;  %vm502_vm9 = vmor %vm500_vm6, %vm501_vm7  ;;  %s1466_s26 = scalar_lea.hbm %s1518_s5, %s1007_s15  ;;  %s1473_s30 = scalar_lea.sflag [#allocation5], %s245_s25 }
  0x4f   : > { %966 = vmatmul.mubr.msk.bf16.vlgmr.msra.gmra.mxu0 %vm352_vm0, %v1139_v14  ;;  %vm531_vm10 = vmand %vm530_vm8, %vm500_vm6  ;;  %s1227_s6 = scalar_lea.vmem %s1468_s16, 256  ;;  %s1303_s22 = smov [#allocation8]  }
  0x50   : > { %1033 = vmatmul.mubr.msk.bf16.vlgmr.msra.gmra.mxu1 %vm352_vm0, %v1140_v15  ;;  %401 = vmatprep.mubr.bf16.mxu0 %v1302_v3  ;;  %p1228_p13 = scmp.ne.s32.totalorder %s1468_s16, %s1227_s6  ;;  %s1231_s7 = sshll.u32 %s1303_s22, 4  ;;  %s1232_s7 = int_to_ptr.vmem [resolvable:$false] %s1231_s7 }
  0x51   : > { %709 = vmatpush1.bf16.msra.mxu0 %v1141_v17  ;;  %1037 = vmatpush3.bf16.msra.mxu1 %v1144_v18  ;;  %s1233_s8 = scalar_lea.vmem %s1232_s7, 512  ;;  %p1234_p1 = scmp.lt.s32.totalorder %s1468_s16, %s1232_s7 }
  0x52   : > { %710 = vmatprep.subr.bf16.mxu0 %v1147_v19  ;;  %1038 = vmatprep.subr.bf16.mxu1 %v1148_v21  ;;  %v532_v19 = vld [vmem:[#allocation2 + $0x8] sm:$0x1]  ;;  %p1229_p8 = pnand %p1228_p13, %p1374_p5  ;;  %p1235_p2 = scmp.lt.s32.totalorder %s1233_s8, %s1227_s6 }
  0x54   : > { %p1230_p12 = pneg %p1229_p8  ;;  %p1236_p4 = por %p1235_p2, %p1234_p1 }
  0x55   : > { %711 = vmatpush1.bf16.msra.mxu0 %v1145_v20  ;;  %1039 = vmatpush3.bf16.msra.mxu1 %v1148_v21 }
  0x56   : > { %712 = vmatprep.subr.bf16.mxu0 %v1151_v22  ;;  %1040 = vmatprep.subr.bf16.mxu1 %v1152_v24  ;;  %p1237_p3 = pnand %p1236_p4, %p1230_p12 }
  0x57   : > { %967 = vmatmul.mubr.msk.bf16.gmra.mxu0 %vm352_vm0, %v1140_v15 }
  0x58   : > { %740 = vmatprep.mubr.bf16.mxu0 %v1302_v3 }
  0x59   : > { %713 = vmatpush1.bf16.msra.mxu0 %v1149_v23  ;;  %1041 = vmatpush3.bf16.msra.mxu1 %v1152_v24 }
  0x5a   : > { %714 = vmatprep.subr.bf16.mxu0 %v1155_v25  ;;  %1042 = vmatprep.subr.bf16.mxu1 %v1156_v27 }
  0x5d   : > { %715 = vmatpush1.bf16.msra.mxu0 %v1153_v26  ;;  %1043 = vmatpush3.bf16.msra.mxu1 %v1156_v27 }
  0x5e   : > { %716 = vmatprep.subr.bf16.mxu0 %v1159_v28  ;;  %1044 = vmatprep.subr.bf16.mxu1 %v1160_v30 }
  0x61   : > { %717 = vmatpush1.bf16.msra.mxu0 %v1157_v29  ;;  %1045 = vmatpush3.bf16.msra.mxu1 %v1160_v30 }
  0x62   : > { %718 = vmatprep.subr.bf16.mxu0 %v1163_v31  ;;  %1046 = vmatprep.subr.bf16.mxu1 %v1164_v33 }
  0x65   : > { %719 = vmatpush1.bf16.msra.mxu0 %v1161_v32  ;;  %1047 = vmatpush3.bf16.msra.mxu1 %v1164_v33 }
  0x66   : > { %720 = vmatprep.subr.bf16.mxu0 %v1167_v34  ;;  %1048 = vmatprep.subr.bf16.mxu1 %v1168_v36 }
  0x69   : > { %721 = vmatpush1.bf16.msra.mxu0 %v1165_v35  ;;  %1049 = vmatpush3.bf16.msra.mxu1 %v1168_v36 }
  0x6a   : > { %722 = vmatprep.subr.bf16.mxu0 %v1171_v37  ;;  %1050 = vmatprep.subr.bf16.mxu1 %v1172_v38 }
  0x6d   : > { %723 = vmatpush1.bf16.msra.mxu0 %v1169_v39  ;;  %1051 = vmatpush3.bf16.msra.mxu1 %v1172_v38 }
 0x10f   : > { %v393_v40 = vpop.f32.mrf.mxu0 }
 0x110   : > { %v1034_v41 = vpop.f32.mrf.mxu1 }
 0x111   : > { %v395_v42 = vpop.f32.mrf.mxu0  ;;  %v477_v56 = vrot.slane %v1034_v41, 2 }
 0x112   : > { %v443_v43 = vpop.f32.mrf.mxu1  ;;  %v461_v48 = vrot.slane %v395_v42, 1 }
 0x113   : > { %v397_v44 = vpop.f32.mrf.mxu0  ;;  %v474_v49 = vrot.slane %v443_v43, 2  ;;  %v999_v43 = vld [vmem:[%s1517_s4] ss:$0 sm:$0xff] }
 0x114   : > { %v1035_v45 = vpop.f32.mrf.mxu1 }
 0x115   : > { %v399_v46 = vpop.f32.mrf.mxu0 }
 0x116   : > { %v446_v47 = vpop.f32.mrf.mxu1  ;;  %v462_v50 = vrot.slane %v399_v46, 1 }
 0x117   : > { %v475_v51 = vrot.slane %v446_v47, 2  ;;  %v403_v52 = vpop.f32.mrf.mxu0 }
 0x118   : > { %v463_v53 = vsel %vm460_vm1, %v461_v48, %v462_v50 }
 0x119   : > { %v468_v54 = vadd.f32 %v463_v53, %v393_v40  ;;  %v404_v55 = vpop.f32.mrf.mxu0  ;;  %v476_v57 = vsel %vm473_vm2, %v474_v49, %v475_v51  ;;  %v478_v2 = vsel %vm473_vm2, %v475_v51, %v477_v56 }
 0x11a   : > { %v464_v59 = vrot.slane %v404_v55, 1 }
 0x11b   : > { %v481_v60 = vadd.f32 %v476_v57, %v468_v54  ;;  %v406_v61 = vpop.f32.mrf.mxu0 }
 0x11c   : > { %v465_v62 = vsel %vm460_vm1, %v462_v50, %v464_v59 }
 0x11d   : > { %v490_v63 = vadd.f32 %v970_v58, %v481_v60  ;;  %v469_v0 = vadd.f32 %v465_v62, %v397_v44  ;;  %v407_v1 = vpop.f32.mrf.mxu0 }
 0x11f   : > { %v492_v4 = vmax.f32 %v490_v63, 0.0  ;;  %v482_v5 = vadd.f32 %v478_v2, %v469_v0 }
 0x121   : > { %v1005_v6 = vpack.c.bf16 %v492_v4, %v492_v4  ;;  %v491_v7 = vadd.f32 %v970_v58, %v482_v5 }
 0x123   : > { %v504_v8 = vshrl.u32 %v1005_v6, 16  ;;  %v493_v9 = vmax.f32 %v491_v7, 0.0  ;;  %v507_v11 = vshll.u32 %v1005_v6, 16 }
 0x125   : > { %v506_v10 = vrot.slane %v504_v8, 7  ;;  %v1006_v12 = vpack.c.bf16 %v493_v9, %v493_v9 }
 0x127   : > { %v509_v14 = vor.u32 %v507_v11, %v506_v10  ;;  %v512_v15 = vshrl.u32 %v1006_v12, 16  ;;  %v515_v18 = vshll.u32 %v1006_v12, 16  ;;  %v510_v20 = vrot.slane %v506_v10, 4 }
 0x129   : > { %v527_v16 = vsel %vm525_vm5, %v509_v14, %v526_v13  ;;  %v514_v17 = vrot.slane %v512_v15, 7 }
 0x12a   : > { %528 = vst [vmem:[#allocation2] sm:$0xf] %v527_v16 }
 0x12b   : > { %v517_v21 = vor.u32 %v515_v18, %v514_v17  ;;  %v519_v22 = vrot.slane %v514_v17, 4 }
 0x12d   : > { %v518_v23 = vsel %vm502_vm9, %v510_v20, %v517_v21  ;;  %v533_v24 = vsel %vm531_vm10, %v519_v22, %v532_v19 }
 0x12e   : > { %529 = vst [vmem:[#allocation2 + $0x4] sm:$0xf] %v518_v23  ;;  %534 = vst [vmem:[#allocation2 + $0x8] sm:$0x1] %v533_v24 }
 0x135   : > { %v1173_v25 = vld [vmem:[#allocation2] sm:$0xff]   ;;  %v1174_v26 = vld [vmem:[#allocation2 + $0x8] ss:$0 sps:$4 sm:$0x11]  }
 0x136   : > { %741 = vmatmul.mubr.bf16.vlgmr.msra.gmra.mxu0 %v1173_v25  ;;  %1052 = vmatprep.mubr.bf16.mxu1 %v1173_v25 }
 0x137   : > { %1053 = vmatmul.mubr.bf16.vlgmr.msra.gmra.mxu1 %v1174_v26  ;;  %750 = vmatprep.mubr.bf16.mxu0 %v1302_v3 }
 0x13e   : > { %751 = vmatmul.mubr.bf16.gmra.mxu0 %v1174_v26 }
 0x1f6   : > { %v742_v27 = vpop.f32.mrf.mxu0 }
 0x1f7   : > { %v1054_v28 = vpop.f32.mrf.mxu1 }
 0x1f8   : > { %v744_v29 = vpop.f32.mrf.mxu0  ;;  %v824_v47 = vrot.slane %v1054_v28, 2 }
 0x1f9   : > { %v792_v30 = vpop.f32.mrf.mxu1  ;;  %v809_v34 = vrot.slane %v744_v29, 1 }
 0x1fa   : > { %v746_v31 = vpop.f32.mrf.mxu0  ;;  %v821_v37 = vrot.slane %v792_v30, 2 }
 0x1fb   : > { %v1055_v32 = vpop.f32.mrf.mxu1 }
 0x1fc   : > { %v748_v33 = vpop.f32.mrf.mxu0 }
 0x1fd   : > { %v810_v35 = vrot.slane %v748_v33, 1  ;;  %v795_v36 = vpop.f32.mrf.mxu1 }
 0x1fe   : > { %v822_v38 = vrot.slane %v795_v36, 2  ;;  %v752_v39 = vpop.f32.mrf.mxu0 }
 0x1ff   : > { %v811_v40 = vsel %vm460_vm1, %v809_v34, %v810_v35 }
 0x200   : > { %v816_v41 = vadd.f32 %v811_v40, %v742_v27  ;;  %v823_v3 = vsel %vm473_vm2, %v821_v37, %v822_v38  ;;  %v753_v42 = vpop.f32.mrf.mxu0  ;;  %v825_v52 = vsel %vm473_vm2, %v822_v38, %v824_v47 }
 0x201   : > { %v812_v44 = vrot.slane %v753_v42, 1 }
 0x202   : > { %v828_v45 = vadd.f32 %v823_v3, %v816_v41  ;;  %v755_v46 = vpop.f32.mrf.mxu0 }
 0x203   : > { %v813_v48 = vsel %vm460_vm1, %v810_v35, %v812_v44 }
 0x204   : > { %v837_v49 = vadd.f32 %v999_v43, %v828_v45  ;;  %v817_v50 = vadd.f32 %v813_v48, %v746_v31  ;;  %v756_v51 = vpop.f32.mrf.mxu0 }
 0x206   : > { %v839_v53 = vmax.f32 %v837_v49, 0.0  ;;  %v829_v54 = vadd.f32 %v825_v52, %v817_v50 }
 0x208   : > { %841 = vst [vmem:[%s1436_s10] sm:$0xff] %v839_v53  ;;  %v838_v55 = vadd.f32 %v999_v43, %v829_v54 }
 0x20a   : > { %v840_v56 = vmax.f32 %v838_v55, 0.0 }
 0x20c   : > { %842 = vst [vmem:[%s1436_s10 + $0x8] sm:$0xff] %v840_v56 }
 0x20d   : > { %1240 = shalt.err (!%p1237_p3)
}
 0x20e   : > { %s1241_s25 = scalar_lea.hbm %s1466_s26, 256  ;;  %s1245_s11 = scalar_lea.hbm %s1518_s5, 512 }
 0x20f   : > { %p1242_p7 = scmp.ne.s32.totalorder %s1466_s26, %s1241_s25  ;;  %p1246_p6 = scmp.lt.s32.totalorder %s1466_s26, %s1518_s5 }
 0x210   : > { %p1247_p10 = scmp.lt.s32.totalorder %s1245_s11, %s1241_s25 }
 0x211   : > { %p1243_p9 = pnand %p1242_p7, %p1374_p5 }
 0x212   : > { %p1248_p11 = por %p1247_p10, %p1246_p6 }
 0x213   : > { %p1244_p0 = pneg %p1243_p9 }
 0x215   : > { %p1249_p13 = pnand %p1248_p11, %p1244_p0 }
 0x217   : > { %1252 = shalt.err (!%p1249_p13)
}
 0x218   : > { %s1304_s14 = smov 128   ;;  %s1305_s15 = smov 8  }
 0x219   : > { %1065 = dma.vmem_to_hbm [thread:$0]  (%p1374_p5), %s1468_s16, 256, %s1466_s26, %s1473_s30, %s1304_s14, %s1304_s14, %s1305_s15  }
 0x21a PF: > { %p1082_p8 = scmp.ge.s32.totalorder %s1295_s21, 2  ;;  %s872_s17 = sand.u32 1, %s1283_s18  }
 0x21b   : > { %p1529_p12 = scmp.ne.s32.totalorder %s1521_s29, 0  ;;  %s873_s23 = scalar_lea.sflag [#allocation5], %s872_s17 }
 0x21d   : > { %p1075_p1 = pnand %p1082_p8, %p1529_p12 }
 0x21f   : > { %p1076_p2 = pneg %p1075_p1 }
 0x221   : > { %1278 = dma.done.wait (%p1076_p2), %s873_s23, 256  }
 0x222   : > { %1280 = vsyncadd (%p1076_p2), %s873_s23, 4294967040  ;;  %p17_p4 = scmp.ge.s32.totalorder %s1361_s24, 4   ;;  %s1530_s18 = smov %s1287_s19 }
 0x223   : > { %s1531_s19 = smov %s1291_s20  ;;  %s1532_s20 = smov %s1372_s27 }
 0x224   : > { %s1533_s21 = smov %s1361_s24  ;;  %19 = sbr.rel (!%p17_p4) target bundleno = 5 (0x5), region = 88 }
 0x229   :  { %878 = vsyncpa [#allocation4], 1 }
 0x22a   :  { %880 = vsyncpa [#allocation4 + $0x1], 1 }
 0x22b   :  { %881 = vsyncpa [#allocation7], 1 }
 0x22c   :  { %882 = vsyncpa [#allocation5], 1 }
 0x22d   :  { %884 = vsyncpa [#allocation5 + $0x1], 1 }

</bundles_post_ra>
